<compile_context>
chip_gen: v6e
topology: v6e:2x2x1
jax: 0.10.0
libtpu: 0.0.40
codegen_flags: <defaults>
</compile_context>

<pallas_src>
import jax
import jax.numpy as jnp
from jax.experimental import pallas as pl
from jax.experimental.pallas import tpu as pltpu


def simplenet_kernel(scalars_ref, x_ref, w1_ref, b1_ref, w2_ref, b2_ref, w3_ref, o_ref):
    """Whole forward pass for one lane-dense batch tile. Weights resident in VMEM."""
    a = scalars_ref[0]        # shared PReLU slope (nn.PReLU(init=0.5), single parameter)
    b3 = scalars_ref[1]       # fc3 scalar bias

    x = x_ref[...]            # (1, tn)  -- batch on lanes

    # fc1 (1 -> 50): outer-product broadcast on the VPU (K=1 matmul would waste the MXU).
    h = w1_ref[...] * x + b1_ref[...]                # (50, 1)*(1, tn)+(50, 1) -> (50, tn)
    h = jnp.where(h >= 0, h, a * h)                  # PReLU

    # fc2 (50 -> 25): real matmul; batch is the lane-dense MXU N dimension.
    h = jnp.dot(w2_ref[...], h, preferred_element_type=jnp.float32) + b2_ref[...]
    h = jnp.tanh(h)                                  # (25, tn)

    # fc3 (25 -> 1): weighted sublane reduction instead of an M=1 MXU matmul.
    y = jnp.sum(h * w3_ref[...], axis=0, keepdims=True) + b3   # (1, tn)
    o_ref[...] = jnp.where(y >= 0, y, a * y)         # PReLU (same shared alpha)


def simplenet_forward(x, params, *, max_tile=2048):
    """x: (N, 1) float32 -> (N, 1) float32.

    Batch is mapped to the lane axis. N is zero-padded to a multiple of 128; the tile
    covers the whole (padded) batch when small, otherwise <= max_tile lanes per grid step
    (multiple steps keep both v7x TensorCores busy and stay within v7x's 64 MiB VMEM).
    """
    N, F = x.shape
    assert F == 1
    w1, b1, w2, b2, w3, b3, alpha = params

    tn = int(min(max_tile, pl.cdiv(N, 128) * 128))   # lane-aligned batch tile
    n_pad = int(pl.cdiv(N, tn)) * tn

    # Lane-dense transposed input: (1, n_pad) with batch on lanes.
    xt = jnp.zeros((1, n_pad), jnp.float32).at[0, :N].set(x[:, 0])

    # Scalars (PReLU alpha, fc3 bias) go to SMEM via scalar prefetch.
    scalars = jnp.stack([alpha, b3]).astype(jnp.float32)          # (2,)

    full = lambda arr: pl.BlockSpec(arr.shape, lambda i, s: (0,) * arr.ndim)

    yt = pl.pallas_call(
        simplenet_kernel,
        out_shape=jax.ShapeDtypeStruct((1, n_pad), jnp.float32),
        grid_spec=pltpu.PrefetchScalarGridSpec(
            num_scalar_prefetch=1,
            grid=(n_pad // tn,),
            in_specs=[
                pl.BlockSpec((1, tn), lambda i, s: (0, i)),   # x tile (lane-dense)
                full(w1), full(b1),                           # (50, 1), (50, 1)
                full(w2), full(b2),                           # (25, 50), (25, 1)
                full(w3),                                     # (25, 1)
            ],
            out_specs=pl.BlockSpec((1, tn), lambda i, s: (0, i)),
        ),
        compiler_params=pltpu.CompilerParams(
            dimension_semantics=("parallel",)),
    )(scalars, xt, w1, b1, w2, b2, w3)

    return yt[0, :N].reshape(N, 1)


def init_params(key):
    """Deterministic synthetic init matching the PyTorch module's shapes.

    fc1/fc2 weights use torch's (out_features, in_features) layout directly; fc3 weight
    is stored as its transpose (25, 1) column; biases are columns / scalars.
    """
    k1, k2, k3, k4, k5, k6 = jax.random.split(key, 6)
    w1 = jax.random.uniform(k1, (50, 1), jnp.float32, -1.0, 1.0)     # Linear(1, 50).weight
    b1 = jax.random.uniform(k2, (50, 1), jnp.float32, -1.0, 1.0)     # Linear(1, 50).bias
    w2 = jax.random.uniform(k3, (25, 50), jnp.float32, -0.14, 0.14)  # Linear(50, 25).weight
    b2 = jax.random.uniform(k4, (25, 1), jnp.float32, -0.14, 0.14)   # Linear(50, 25).bias
    w3 = jax.random.uniform(k5, (25, 1), jnp.float32, -0.2, 0.2)     # Linear(25, 1).weight.T
    b3 = jax.random.uniform(k6, (), jnp.float32, -0.2, 0.2)          # Linear(25, 1).bias
    alpha = jnp.float32(0.5)                                         # nn.PReLU(init=0.5)
    return (w1, b1, w2, b2, w3, b3, alpha)


def reference_forward(x, params):
    """Pure-JAX reference with identical semantics (PReLU -> Tanh -> PReLU)."""
    w1, b1, w2, b2, w3, b3, alpha = params
    prelu = lambda v: jnp.where(v >= 0, v, alpha * v)
    h = prelu(x @ w1.T + b1[:, 0])        # (N, 50)
    h = jnp.tanh(h @ w2.T + b2[:, 0])     # (N, 25)
    return prelu(h @ w3 + b3)             # (N, 1)


if __name__ == "__main__":
    key = jax.random.PRNGKey(0)
    pkey, xkey = jax.random.split(key)
    params = init_params(pkey)

    # Small batches of scalar inputs (single-variable function approximation).
    # 900 matches the spec's np.linspace(-5, 5, 900) size and exercises lane padding.
    for N in (256, 900):
        x = jax.random.uniform(jax.random.fold_in(xkey, N), (N, 1),
                               jnp.float32, -5.0, 5.0)
        out = jax.block_until_ready(simplenet_forward(x, params))
        ref = reference_forward(x, params)
        assert out.shape == (N, 1)
        assert jnp.allclose(out, ref, atol=1e-5, rtol=1e-5), f"mismatch at N={N}"

    print("KERNEL_OK")
</pallas_src>

<mosaic_0001>
module attributes {stable_mosaic.version = 11 : i64} {
  func.func @simplenet_kernel(%arg0: i32, %arg1: memref<2xf32, #tpu.memory_space<smem>>, %arg2: memref<1x256xf32, #tpu.memory_space<vmem>>, %arg3: memref<50x1xf32, #tpu.memory_space<vmem>>, %arg4: memref<50x1xf32, #tpu.memory_space<vmem>>, %arg5: memref<25x50xf32, #tpu.memory_space<vmem>>, %arg6: memref<25x1xf32, #tpu.memory_space<vmem>>, %arg7: memref<25x1xf32, #tpu.memory_space<vmem>>, %arg8: memref<1x256xf32, #tpu.memory_space<vmem>>) attributes {dimension_semantics = [#tpu.dimension_semantics<parallel>], iteration_bounds = array<i64: 1>, scalar_prefetch = 1 : i64, scratch_operands = 0 : i64, tpu.core_type = #tpu.core_type<tc>, window_params = [{transform_indices = @transform_0, window_bounds = array<i64: 1, 256>}, {pipeline_mode = #tpu.pipeline_mode<synchronous>, transform_indices = @transform_1, window_bounds = array<i64: 50, 1>}, {pipeline_mode = #tpu.pipeline_mode<synchronous>, transform_indices = @transform_2, window_bounds = array<i64: 50, 1>}, {pipeline_mode = #tpu.pipeline_mode<synchronous>, transform_indices = @transform_3, window_bounds = array<i64: 25, 50>}, {pipeline_mode = #tpu.pipeline_mode<synchronous>, transform_indices = @transform_4, window_bounds = array<i64: 25, 1>}, {pipeline_mode = #tpu.pipeline_mode<synchronous>, transform_indices = @transform_5, window_bounds = array<i64: 25, 1>}, {transform_indices = @transform_6, window_bounds = array<i64: 1, 256>}]} {
    %c0 = arith.constant 0 : index
    %0 = memref.load %arg1[%c0] : memref<2xf32, #tpu.memory_space<smem>>
    %c1 = arith.constant 1 : index
    %1 = memref.load %arg1[%c1] : memref<2xf32, #tpu.memory_space<smem>>
    %c0_0 = arith.constant 0 : index
    %c0_1 = arith.constant 0 : index
    %2 = vector.load %arg2[%c0_0, %c0_1] : memref<1x256xf32, #tpu.memory_space<vmem>>, vector<1x256xf32>
    %c0_2 = arith.constant 0 : index
    %c0_3 = arith.constant 0 : index
    %3 = vector.load %arg3[%c0_2, %c0_3] : memref<50x1xf32, #tpu.memory_space<vmem>>, vector<50x1xf32>
    %4 = vector.broadcast %3 : vector<50x1xf32> to vector<50x256xf32>
    %5 = vector.broadcast %2 : vector<1x256xf32> to vector<50x256xf32>
    %6 = arith.mulf %4, %5 : vector<50x256xf32>
    %c0_4 = arith.constant 0 : index
    %c0_5 = arith.constant 0 : index
    %7 = vector.load %arg4[%c0_4, %c0_5] : memref<50x1xf32, #tpu.memory_space<vmem>>, vector<50x1xf32>
    %8 = vector.broadcast %7 : vector<50x1xf32> to vector<50x256xf32>
    %9 = arith.addf %6, %8 : vector<50x256xf32>
    %cst = arith.constant 0.000000e+00 : f32
    %10 = vector.broadcast %cst : f32 to vector<50x256xf32>
    %11 = arith.cmpf oge, %9, %10 : vector<50x256xf32>
    %12 = vector.broadcast %0 : f32 to vector<50x256xf32>
    %13 = arith.mulf %12, %9 : vector<50x256xf32>
    %14 = arith.select %11, %9, %13 : vector<50x256xi1>, vector<50x256xf32>
    %c0_6 = arith.constant 0 : index
    %c0_7 = arith.constant 0 : index
    %15 = vector.load %arg5[%c0_6, %c0_7] : memref<25x50xf32, #tpu.memory_space<vmem>>, vector<25x50xf32>
    %cst_8 = arith.constant dense<0.000000e+00> : vector<25x256xf32>
    %16 = tpu.matmul %15, %14, %cst_8 {dimension_numbers = #tpu.dot_dimension_numbers<[1], [0], [0], [1], [0, 0, 1, 1], [], []>} : vector<25x50xf32>, vector<50x256xf32>, vector<25x256xf32> -> vector<25x256xf32>
    %c0_9 = arith.constant 0 : index
    %c0_10 = arith.constant 0 : index
    %17 = vector.load %arg6[%c0_9, %c0_10] : memref<25x1xf32, #tpu.memory_space<vmem>>, vector<25x1xf32>
    %18 = vector.broadcast %17 : vector<25x1xf32> to vector<25x256xf32>
    %19 = arith.addf %16, %18 : vector<25x256xf32>
    %20 = math.tanh %19 : vector<25x256xf32>
    %c0_11 = arith.constant 0 : index
    %c0_12 = arith.constant 0 : index
    %21 = vector.load %arg7[%c0_11, %c0_12] : memref<25x1xf32, #tpu.memory_space<vmem>>, vector<25x1xf32>
    %22 = vector.broadcast %21 : vector<25x1xf32> to vector<25x256xf32>
    %23 = arith.mulf %20, %22 : vector<25x256xf32>
    %cst_13 = arith.constant dense<0.000000e+00> : vector<256xf32>
    %24 = vector.multi_reduction <add>, %23, %cst_13 [0] : vector<25x256xf32> to vector<256xf32>
    %25 = vector.shape_cast %24 : vector<256xf32> to vector<1x256xf32>
    %26 = vector.broadcast %1 : f32 to vector<1x256xf32>
    %27 = arith.addf %25, %26 : vector<1x256xf32>
    %cst_14 = arith.constant 0.000000e+00 : f32
    %28 = vector.broadcast %cst_14 : f32 to vector<1x256xf32>
    %29 = arith.cmpf oge, %27, %28 : vector<1x256xf32>
    %30 = vector.broadcast %0 : f32 to vector<1x256xf32>
    %31 = arith.mulf %30, %27 : vector<1x256xf32>
    %32 = arith.select %29, %27, %31 : vector<1x256xi1>, vector<1x256xf32>
    %c0_15 = arith.constant 0 : index
    %c0_16 = arith.constant 0 : index
    %33 = vector.load %arg8[%c0_15, %c0_16] : memref<1x256xf32, #tpu.memory_space<vmem>>, vector<1x256xf32>
    tpu.vector_store %arg8[%c0_15, %c0_16], %32 {strides = array<i32>} : memref<1x256xf32, #tpu.memory_space<vmem>>, vector<1x256xf32>,
    return
  }
  func.func @transform_0(%arg0: i32, %arg1: memref<2xf32, #tpu.memory_space<smem>>) -> (i32, i32) {
    %c0_i32 = arith.constant 0 : i32
    %c0_i32_0 = arith.constant 0 : i32
    return %c0_i32, %arg0 : i32, i32
  }
  func.func @transform_1(%arg0: i32, %arg1: memref<2xf32, #tpu.memory_space<smem>>) -> (i32, i32) {
    %c0_i32 = arith.constant 0 : i32
    %c0_i32_0 = arith.constant 0 : i32
    %c0_i32_1 = arith.constant 0 : i32
    return %c0_i32, %c0_i32_0 : i32, i32
  }
  func.func @transform_2(%arg0: i32, %arg1: memref<2xf32, #tpu.memory_space<smem>>) -> (i32, i32) {
    %c0_i32 = arith.constant 0 : i32
    %c0_i32_0 = arith.constant 0 : i32
    %c0_i32_1 = arith.constant 0 : i32
    return %c0_i32, %c0_i32_0 : i32, i32
  }
  func.func @transform_3(%arg0: i32, %arg1: memref<2xf32, #tpu.memory_space<smem>>) -> (i32, i32) {
    %c0_i32 = arith.constant 0 : i32
    %c0_i32_0 = arith.constant 0 : i32
    %c0_i32_1 = arith.constant 0 : i32
    return %c0_i32, %c0_i32_0 : i32, i32
  }
  func.func @transform_4(%arg0: i32, %arg1: memref<2xf32, #tpu.memory_space<smem>>) -> (i32, i32) {
    %c0_i32 = arith.constant 0 : i32
    %c0_i32_0 = arith.constant 0 : i32
    %c0_i32_1 = arith.constant 0 : i32
    return %c0_i32, %c0_i32_0 : i32, i32
  }
  func.func @transform_5(%arg0: i32, %arg1: memref<2xf32, #tpu.memory_space<smem>>) -> (i32, i32) {
    %c0_i32 = arith.constant 0 : i32
    %c0_i32_0 = arith.constant 0 : i32
    %c0_i32_1 = arith.constant 0 : i32
    return %c0_i32, %c0_i32_0 : i32, i32
  }
  func.func @transform_6(%arg0: i32, %arg1: memref<2xf32, #tpu.memory_space<smem>>) -> (i32, i32) {
    %c0_i32 = arith.constant 0 : i32
    %c0_i32_0 = arith.constant 0 : i32
    return %c0_i32, %arg0 : i32, i32
  }
}

</mosaic_0001>

<bundles_post_ra>
// kernel: tpu_custom_call.1
= control target key start
LH: loop header
LB: loop body
LE: loop exit
PB: predicated region body
PF: predicated region fallthrough
CT: control target
= control target key end

     0   :  { %s707_s0 = inlined_call_operand.vmem [shape: f32[2], index: 0, kind: input, shape index: {}]   ;;  %s708_s1 = inlined_call_operand.vmem [shape: f32[1,256], index: 1, kind: input, shape index: {}]   ;;  %s709_s2 = inlined_call_operand.vmem [shape: f32[50,1], index: 2, kind: input, shape index: {}]   ;;  %s710_s3 = inlined_call_operand.vmem [shape: f32[50,1], index: 3, kind: input, shape index: {}]   ;;  %s711_s4 = inlined_call_operand.vmem [shape: f32[25,50], index: 4, kind: input, shape index: {}]   ;;  %s712_s5 = inlined_call_operand.vmem [shape: f32[25,1], index: 5, kind: input, shape index: {}]   ;;  %s713_s6 = inlined_call_operand.vmem [shape: f32[25,1], index: 6, kind: input, shape index: {}]   ;;  %s714_s7 = inlined_call_operand.hbm [shape: f32[1,256], index: 7, kind: output, shape index: {}]  }
   0x1   :  { %s12_s26 = sshll.u32 %s707_s0, 4  ;;  %s13_s26 = int_to_ptr.vmem [resolvable:$true] %s12_s26 }
   0x2   :  { %s488_s27 = scalar_lea.vmem %s13_s26, 16  ;;  %p493_p1 = scmp.lt.s32.totalorder %s13_s26, %s13_s26 }
   0x3   :  { %p489_p0 = scmp.ne.s32.totalorder %s13_s26, %s488_s27  ;;  %p494_p2 = scmp.lt.s32.totalorder %s488_s27, %s488_s27 }
   0x5   :  { %p495_p3 = por %p494_p2, %p493_p1 }
   0x7   :  { %p496_p4 = pnand %p495_p3, %p489_p0 }
   0x9   :  { %499 = shalt.err (!%p496_p4)  }
   0xa   :  { %s524_s28 = smov [#allocation3]  }
   0xb   :  { %15 = dma.vmem_to_smem %s13_s26, 16, %s524_s28, [#allocation2] }
   0xc   :  { %520 = dma.done.wait [#allocation2], 16 }
   0xd   :  { %521 = vsyncadd [#allocation2], 4294967280 }
   0xe   :  { %17 = sfence }
   0xf   :  { %v107_v0 = vld [vmem:[%s710_s3 + $0x30] sm:$0x3]  ;;  %v525_v2 = vmov 0   ;;  %v39_v3 = vld [vmem:[%s709_s2 + $0x28] sm:$0xff]  ;;  %v38_v4 = vld [vmem:[%s709_s2 + $0x20] sm:$0xff] }
  0x10   :  { %v40_v1 = vld [vmem:[%s709_s2 + $0x30] sm:$0x3]  ;;  %471 = vset.pattern.permute.xlu1 %v525_v2  ;;  %470 = vset.pattern.permute.xlu0 %v525_v2  ;;  %v106_v5 = vld [vmem:[%s710_s3 + $0x28] sm:$0xff]  ;;  %v37_v6 = vld [vmem:[%s709_s2 + $0x18] sm:$0xff] }
  0x11   :  { %140 = vperm.xlu1 %471, %v107_v0   ;;  %73 = vperm.xlu0 %470, %v40_v1  }
  0x15   :  { %68 = vperm.xlu0 %470, %v39_v3   ;;  %63 = vperm.xlu1 %471, %v38_v4  }
  0x16   :  { %18 = vsyncpa [#allocation5], 0  ;;  %v105_v7 = vld [vmem:[%s710_s3 + $0x20] sm:$0xff]  ;;  %v36_v8 = vld [vmem:[%s709_s2 + $0x10] sm:$0xff]  ;;  %v526_v19 = vmov 0.0   ;;  %v77_v24 = vlaneseq  ;;  %s31_s24 = sld [smem:[#allocation3]] }
  0x17   :  { %v104_v9 = vld [vmem:[%s710_s3 + $0x18] sm:$0xff]  ;;  %v35_v10 = vld [vmem:[%s709_s2 + $0x8] sm:$0xff]  ;;  %v103_v11 = vld [vmem:[%s710_s3 + $0x10] sm:$0xff]  ;;  %312 = vmatprep.mubr.f32.mxu0 %v526_v19  ;;  %324 = vmatprep.mubr.f32.mxu1 %v526_v19  ;;  %vm241_vm0 = vcmask 1041408   ;;  %vm228_vm15 = vcmask 408576   ;;  %s528_s8 = smov [#allocation4]  }
  0x18   :  { %v34_v12 = vld [vmem:[%s709_s2] sm:$0xff]  ;;  %v102_v13 = vld [vmem:[%s710_s3 + $0x8] sm:$0xff]  ;;  %v206_v17 = vld [vmem:[%s712_s5 + $0x10] sm:$0xff]  ;;  %v641_v25 = vshrl.u32 %v77_v24, 7  ;;  %s436_s9 = sshll.u32 %s528_s8, 4  ;;  %s437_s9 = int_to_ptr.vmem [resolvable:$true] %s436_s9 }
  0x19   :  { %135 = vperm.xlu0 %470, %v106_v5   ;;  %58 = vperm.xlu1 %471, %v37_v6   ;;  %v101_v14 = vld [vmem:[%s710_s3] sm:$0xff]  ;;  %v205_v16 = vld [vmem:[%s712_s5 + $0x8] sm:$0xff]  ;;  %v207_v18 = vld [vmem:[%s712_s5 + $0x18] sm:$0x1]  ;;  %s500_s0 = scalar_lea.vmem %s437_s9, 32  ;;  %p505_p6 = scmp.lt.s32.totalorder %s437_s9, %s437_s9 }
  0x1a   :  { %v204_v15 = vld [vmem:[%s712_s5] sm:$0xff]  ;;  %v346_v21 = vld [vmem:[%s713_s6 + $0x8] sm:$0xff]  ;;  %v347_v22 = vld [vmem:[%s713_s6 + $0x10] sm:$0xff]  ;;  %v79_v26 = vsub.s32 0, %v641_v25  ;;  %v83_v27 = vsub.s32 1, %v641_v25  ;;  %p501_p5 = scmp.ne.s32.totalorder %s437_s9, %s500_s0  ;;  %p506_p7 = scmp.lt.s32.totalorder %s500_s0, %s500_s0 }
  0x1b   :  { %v345_v20 = vld [vmem:[%s713_s6] sm:$0xff]  ;;  %v348_v23 = vld [vmem:[%s713_s6 + $0x18] sm:$0x1] }
  0x1c   :  { %v33_v28 = vld [vmem:[%s708_s1] sm:$0x3]  ;;  %v654_v37 = vstv %s31_s24  ;;  %p507_p8 = por %p506_p7, %p505_p6 }
  0x1d   :  { %130 = vperm.xlu0 %470, %v105_v7   ;;  %53 = vperm.xlu1 %471, %v36_v8   ;;  %v648_v29 = vrot.slane %v33_v28, %v79_v26  ;;  %v650_v30 = vrot.slane %v33_v28, %v83_v27 }
  0x1e   :  { %p508_p9 = pnand %p507_p8, %p501_p5 }
  0x21   :  { %125 = vperm.xlu0 %470, %v104_v9   ;;  %48 = vperm.xlu1 %471, %v35_v10  }
  0x25   :  { %120 = vperm.xlu0 %470, %v103_v11   ;;  %43 = vperm.xlu1 %471, %v34_v12  }
  0x29   :  { %115 = vperm.xlu0 %470, %v102_v13   ;;  %110 = vperm.xlu1 %471, %v101_v14  }
  0x2d   :  { %210 = vperm.xlu0 %470, %v204_v15   ;;  %215 = vperm.xlu1 %471, %v205_v16  }
  0x31   :  { %220 = vperm.xlu0 %470, %v206_v17   ;;  %225 = vperm.xlu1 %471, %v207_v18  }
  0x35   :  { %351 = vperm.xlu0 %470, %v345_v20   ;;  %356 = vperm.xlu1 %471, %v346_v21  }
  0x39   :  { %361 = vperm.xlu0 %470, %v347_v22   ;;  %366 = vperm.xlu1 %471, %v348_v23  }
  0x8c   :  { %v141_v31 = vpop.permute.xlu1 %140  ;;  %v74_v32 = vpop.permute.xlu0 %73 }
  0x8d   :  { %v99_v33 = vmul.f32 %v648_v29, %v74_v32  ;;  %v100_v34 = vmul.f32 %v650_v30, %v74_v32 }
  0x8f   :  { %v155_v35 = vadd.f32 %v141_v31, %v99_v33  ;;  %v156_v36 = vadd.f32 %v141_v31, %v100_v34 }
  0x90   :  { %v69_v38 = vpop.permute.xlu0 %68  ;;  %v64_v39 = vpop.permute.xlu1 %63 }
  0x91   :  { %vm170_vm1 = vcmp.ge.f32.partialorder %v156_v36, 0.0  ;;  %v185_v40 = vmul.f32 %v654_v37, %v156_v36  ;;  %vm169_vm2 = vcmp.ge.f32.partialorder %v155_v35, 0.0  ;;  %v184_v41 = vmul.f32 %v654_v37, %v155_v35 }
  0x92   :  { %v97_v42 = vmul.f32 %v648_v29, %v69_v38  ;;  %v98_v43 = vmul.f32 %v650_v30, %v69_v38  ;;  %v95_v50 = vmul.f32 %v648_v29, %v64_v39  ;;  %v96_v51 = vmul.f32 %v650_v30, %v64_v39 }
  0x93   :  { %v199_v46 = vsel %vm170_vm1, %v156_v36, %v185_v40  ;;  %v198_v47 = vsel %vm169_vm2, %v155_v35, %v184_v41  ;;  %v200_v41 = vld [vmem:[%s711_s4] sm:$0xff] }
  0x94   :  { %v136_v44 = vpop.permute.xlu0 %135  ;;  %v59_v45 = vpop.permute.xlu1 %58  ;;  %445 = vmatprep.subr.msk.mxu0 %vm241_vm0, %v199_v46  ;;  %451 = vmatprep.subr.msk.mxu1 %vm241_vm0, %v199_v46 }
  0x95   :  { %v153_v48 = vadd.f32 %v136_v44, %v97_v42  ;;  %v154_v49 = vadd.f32 %v136_v44, %v98_v43  ;;  %446 = vmatpush1.msk.msra.mxu0 %vm241_vm0, %v198_v47  ;;  %458 = vmatpush1.msk.msra.mxu1 %vm241_vm0, %v198_v47  ;;  %v93_v58 = vmul.f32 %v648_v29, %v59_v45  ;;  %v202_v42 = vld [vmem:[%s711_s4 + $0x10] sm:$0xff]  ;;  %v201_v44 = vld [vmem:[%s711_s4 + $0x8] sm:$0xff]  ;;  %vm379_vm0 = vcmask 1040384  }
  0x96   :  { %v94_v59 = vmul.f32 %v650_v30, %v59_v45  ;;  %v203_v45 = vld [vmem:[%s711_s4 + $0x18] sm:$0x1]  ;;  %s444_s4 = sld [smem:[#allocation3 + $0x1]] }
  0x97   :  { %vm168_vm3 = vcmp.ge.f32.partialorder %v154_v49, 0.0  ;;  %v183_v52 = vmul.f32 %v654_v37, %v154_v49  ;;  %vm167_vm4 = vcmp.ge.f32.partialorder %v153_v48, 0.0  ;;  %v182_v53 = vmul.f32 %v654_v37, %v153_v48 }
  0x98   :  { %v131_v54 = vpop.permute.xlu0 %130  ;;  %v54_v55 = vpop.permute.xlu1 %53 }
  0x99   :  { %v151_v56 = vadd.f32 %v131_v54, %v95_v50  ;;  %v152_v57 = vadd.f32 %v131_v54, %v96_v51  ;;  %v197_v60 = vsel %vm168_vm3, %v154_v49, %v183_v52  ;;  %v196_v61 = vsel %vm167_vm4, %v153_v48, %v182_v53 }
  0x9a   :  { %268 = vmatprep.subr.mxu0 %v197_v60  ;;  %452 = vmatprep.subr.mxu1 %v197_v60  ;;  %v91_v4 = vmul.f32 %v648_v29, %v54_v55  ;;  %v92_v5 = vmul.f32 %v650_v30, %v54_v55  ;;  %vm427_vm3 = vcmp.lt.s32.totalorder %v77_v24, 256 }
  0x9b   :  { %vm166_vm5 = vcmp.ge.f32.partialorder %v152_v57, 0.0  ;;  %v181_v62 = vmul.f32 %v654_v37, %v152_v57  ;;  %vm165_vm6 = vcmp.ge.f32.partialorder %v151_v56, 0.0  ;;  %v180_v63 = vmul.f32 %v654_v37, %v151_v56  ;;  %269 = vmatpush1.msra.mxu0 %v196_v61  ;;  %459 = vmatpush1.msra.mxu1 %v196_v61 }
  0x9c   :  { %v126_v0 = vpop.permute.xlu0 %125  ;;  %v49_v1 = vpop.permute.xlu1 %48 }
  0x9d   :  { %v149_v2 = vadd.f32 %v126_v0, %v93_v58  ;;  %v150_v3 = vadd.f32 %v126_v0, %v94_v59  ;;  %v195_v6 = vsel %vm166_vm5, %v152_v57, %v181_v62  ;;  %v194_v7 = vsel %vm165_vm6, %v151_v56, %v180_v63 }
  0x9e   :  { %270 = vmatprep.subr.mxu0 %v195_v6  ;;  %453 = vmatprep.subr.mxu1 %v195_v6  ;;  %v89_v12 = vmul.f32 %v648_v29, %v49_v1  ;;  %v90_v13 = vmul.f32 %v650_v30, %v49_v1 }
  0x9f   :  { %vm164_vm7 = vcmp.ge.f32.partialorder %v150_v3, 0.0  ;;  %v179_v8 = vmul.f32 %v654_v37, %v150_v3  ;;  %vm163_vm8 = vcmp.ge.f32.partialorder %v149_v2, 0.0  ;;  %v178_v9 = vmul.f32 %v654_v37, %v149_v2  ;;  %271 = vmatpush1.msra.mxu0 %v194_v7  ;;  %460 = vmatpush1.msra.mxu1 %v194_v7 }
  0xa0   :  { %v121_v10 = vpop.permute.xlu0 %120  ;;  %v44_v11 = vpop.permute.xlu1 %43 }
  0xa1   :  { %v147_v14 = vadd.f32 %v121_v10, %v91_v4  ;;  %v148_v15 = vadd.f32 %v121_v10, %v92_v5  ;;  %v87_v16 = vmul.f32 %v648_v29, %v44_v11  ;;  %v88_v17 = vmul.f32 %v650_v30, %v44_v11 }
  0xa2   :  { %v193_v18 = vsel %vm164_vm7, %v150_v3, %v179_v8  ;;  %v192_v20 = vsel %vm163_vm8, %v149_v2, %v178_v9 }
  0xa3   :  { %272 = vmatprep.subr.mxu0 %v193_v18  ;;  %454 = vmatprep.subr.mxu1 %v193_v18  ;;  %vm162_vm9 = vcmp.ge.f32.partialorder %v148_v15, 0.0  ;;  %v177_v21 = vmul.f32 %v654_v37, %v148_v15  ;;  %vm161_vm10 = vcmp.ge.f32.partialorder %v147_v14, 0.0  ;;  %v176_v22 = vmul.f32 %v654_v37, %v147_v14 }
  0xa4   :  { %273 = vmatpush1.msra.mxu0 %v192_v20  ;;  %461 = vmatpush1.msra.mxu1 %v192_v20  ;;  %v116_v23 = vpop.permute.xlu0 %115  ;;  %v111_v26 = vpop.permute.xlu1 %110 }
  0xa5   :  { %v145_v27 = vadd.f32 %v116_v23, %v89_v12  ;;  %v146_v28 = vadd.f32 %v116_v23, %v90_v13  ;;  %v143_v31 = vadd.f32 %v111_v26, %v87_v16  ;;  %v144_v29 = vadd.f32 %v111_v26, %v88_v17 }
  0xa6   :  { %v191_v32 = vsel %vm162_vm9, %v148_v15, %v177_v21  ;;  %v190_v30 = vsel %vm161_vm10, %v147_v14, %v176_v22 }
  0xa7   :  { %274 = vmatprep.subr.mxu0 %v191_v32  ;;  %455 = vmatprep.subr.mxu1 %v191_v32  ;;  %vm160_vm11 = vcmp.ge.f32.partialorder %v146_v28, 0.0  ;;  %v175_v33 = vmul.f32 %v654_v37, %v146_v28  ;;  %vm159_vm12 = vcmp.ge.f32.partialorder %v145_v27, 0.0  ;;  %v174_v34 = vmul.f32 %v654_v37, %v145_v27 }
  0xa8   :  { %275 = vmatpush1.msra.mxu0 %v190_v30  ;;  %462 = vmatpush1.msra.mxu1 %v190_v30  ;;  %vm158_vm13 = vcmp.ge.f32.partialorder %v144_v29, 0.0  ;;  %v173_v35 = vmul.f32 %v654_v37, %v144_v29  ;;  %v172_v36 = vmul.f32 %v654_v37, %v143_v31  ;;  %vm157_vm14 = vcmp.ge.f32.partialorder %v143_v31, 0.0  ;;  %v211_v46 = vpop.permute.xlu0 %210  ;;  %v216_v47 = vpop.permute.xlu1 %215 }
  0xa9   :  { %v189_v38 = vsel %vm160_vm11, %v146_v28, %v175_v33  ;;  %v188_v39 = vsel %vm159_vm12, %v145_v27, %v174_v34 }
  0xaa   :  { %276 = vmatprep.subr.mxu0 %v189_v38  ;;  %456 = vmatprep.subr.mxu1 %v189_v38  ;;  %v187_v40 = vsel %vm158_vm13, %v144_v29, %v173_v35  ;;  %v186_v43 = vsel %vm157_vm14, %v143_v31, %v172_v36 }
  0xab   :  { %277 = vmatpush1.msra.mxu0 %v188_v39  ;;  %463 = vmatpush1.msra.mxu1 %v188_v39 }
  0xac   :  { %278 = vmatprep.subr.mxu0 %v187_v40  ;;  %457 = vmatprep.subr.mxu1 %v187_v40  ;;  %v221_v48 = vpop.permute.xlu0 %220 }
  0xad   :  { %279 = vmatpush1.msra.mxu0 %v186_v43  ;;  %464 = vmatpush1.msra.mxu1 %v186_v43  ;;  %v527_v43 = vmov 1966171168  }
  0xae   :  { %447 = vmatmul.mubr.msk.f32.vlgmr.msra.gmra.mxu0 %vm228_vm15, %v200_v41  ;;  %449 = vmatmul.mubr.msk.f32.vlgmr.msra.gmra.mxu1 %vm228_vm15, %v202_v42  ;;  %v398_v42 = vstv %s444_s4 }
  0xaf   :  { %318 = vmatprep.mubr.f32.mxu0 %v526_v19  ;;  %330 = vmatprep.mubr.f32.mxu1 %v526_v19  ;;  %v226_v19 = vpop.permute.xlu1 %225 }
  0xb0   :  { %v352_v3 = vpop.permute.xlu0 %351 }
  0xb2   :  { %448 = vmatmul.mubr.msk.f32.gmra.mxu0 %vm228_vm15, %v201_v44  ;;  %450 = vmatmul.mubr.msk.f32.gmra.mxu1 %vm228_vm15, %v203_v45  ;;  %v411_v44 = vunpack.c.l.s4 %v527_v43 }
  0xb3   :  { %v357_v1 = vpop.permute.xlu1 %356 }
  0xb4   :  { %v362_v13 = vpop.permute.xlu0 %361 }
  0xb7   :  { %v367_v9 = vpop.permute.xlu1 %366 }
 0x16e   :  { %v314_v49 = vpop.f32.mrf.mxu0  ;;  %v326_v50 = vpop.f32.mrf.mxu1 }
 0x16f   :  { %v315_v51 = vadd.f32 %v314_v49, %v211_v46  ;;  %v327_v52 = vadd.f32 %v326_v50, %v221_v48  ;;  %v412_v49 = vunpack.c.0.s8 %v411_v44 }
 0x170   :  { %v316_v53 = vpop.f32.mrf.mxu0  ;;  %v328_v54 = vpop.f32.mrf.mxu1 }
 0x171   :  { %472 = vtanh.f32 %v315_v51  ;;  %v317_v55 = vadd.f32 %v316_v53, %v211_v46  ;;  %v329_v56 = vadd.f32 %v328_v54, %v221_v48  ;;  %v415_v53 = vsub.s32 %v412_v49, %v641_v25 }
 0x172   :  { %474 = vtanh.f32 %v327_v52  ;;  %v320_v57 = vpop.f32.mrf.mxu0  ;;  %v332_v58 = vpop.f32.mrf.mxu1 }
 0x173   :  { %476 = vtanh.f32 %v317_v55  ;;  %v321_v59 = vadd.f32 %v320_v57, %v216_v47  ;;  %v333_v60 = vadd.f32 %v332_v58, %v226_v19 }
 0x174   :  { %478 = vtanh.f32 %v329_v56  ;;  %v322_v61 = vpop.f32.mrf.mxu0  ;;  %v334_v62 = vpop.f32.mrf.mxu1 }
 0x175   :  { %480 = vtanh.f32 %v321_v59  ;;  %v323_v63 = vadd.f32 %v322_v61, %v216_v47  ;;  %v335_v0 = vadd.f32 %v334_v62, %v226_v19 }
 0x176   :  { %482 = vtanh.f32 %v333_v60 }
 0x177   :  { %484 = vtanh.f32 %v323_v63 }
 0x178   :  { %486 = vtanh.f32 %v335_v0 }
 0x17e   :  { %v473_v2 = vpop.eup %472 }
 0x17f   :  { %v475_v4 = vpop.eup %474  ;;  %v369_v10 = vmul.f32 %v473_v2, %v352_v3 }
 0x180   :  { %v477_v5 = vpop.eup %476  ;;  %v373_v16 = vmul.f32 %v475_v4, %v362_v13 }
 0x181   :  { %v479_v6 = vpop.eup %478  ;;  %v370_v17 = vmul.f32 %v477_v5, %v352_v3 }
 0x182   :  { %v481_v7 = vpop.eup %480  ;;  %v374_v22 = vmul.f32 %v479_v6, %v362_v13 }
 0x183   :  { %v483_v8 = vpop.eup %482  ;;  %v371_v11 = vmul.f32 %v481_v7, %v357_v1 }
 0x184   :  { %v485_v12 = vpop.eup %484  ;;  %v375_v14 = vmul.f32 %v483_v8, %v367_v9 }
 0x185   :  { %v487_v15 = vpop.eup %486  ;;  %v377_v18 = vadd.f32 %v371_v11, %v369_v10  ;;  %v372_v20 = vmul.f32 %v485_v12, %v357_v1 }
 0x186   :  { %v376_v21 = vmul.f32 %v487_v15, %v367_v9  ;;  %v380_v27 = vsel %vm379_vm0, %v375_v14, 0.0 }
 0x187   :  { %v378_v23 = vadd.f32 %v377_v18, %v373_v16  ;;  %v388_v26 = vadd.f32 %v372_v20, %v370_v17 }
 0x188   :  { %v390_v29 = vsel %vm379_vm0, %v376_v21, 0.0 }
 0x189   :  { %v381_v28 = vadd.f32 %v380_v27, %v378_v23  ;;  %v389_v31 = vadd.f32 %v388_v26, %v374_v22 }
 0x18b   :  { %v382_v32 = vrot.slane %v381_v28, 4  ;;  %v391_v30 = vadd.f32 %v390_v29, %v389_v31 }
 0x18d   :  { %v392_v33 = vrot.slane %v391_v30, 4  ;;  %v383_v34 = vadd.f32 %v382_v32, %v381_v28 }
 0x18f   :  { %v384_v35 = vrot.slane %v383_v34, 2  ;;  %v393_v36 = vadd.f32 %v392_v33, %v391_v30 }
 0x191   :  { %v385_v38 = vadd.f32 %v384_v35, %v383_v34  ;;  %v394_v39 = vrot.slane %v393_v36, 2 }
 0x193   :  { %v386_v40 = vrot.slane %v385_v38, 1  ;;  %v395_v41 = vadd.f32 %v394_v39, %v393_v36 }
 0x195   :  { %v387_v45 = vadd.f32 %v386_v40, %v385_v38  ;;  %v396_v46 = vrot.slane %v395_v41, 1 }
 0x197   :  { %v397_v47 = vadd.f32 %v396_v46, %v395_v41  ;;  %v399_v48 = vadd.f32 %v398_v42, %v387_v45 }
 0x199   :  { %v400_v50 = vadd.f32 %v398_v42, %v397_v47  ;;  %v403_v51 = vmul.f32 %v399_v48, %v654_v37  ;;  %vm401_vm1 = vcmp.ge.f32.partialorder %v399_v48, 0.0 }
 0x19b   :  { %vm402_vm2 = vcmp.ge.f32.partialorder %v400_v50, 0.0  ;;  %v404_v52 = vmul.f32 %v400_v50, %v654_v37  ;;  %v405_v54 = vsel %vm401_vm1, %v399_v48, %v403_v51 }
 0x19d   :  { %v406_v19 = vsel %vm402_vm2, %v400_v50, %v404_v52 }
 0x19e   :  { %v409_v55 = vcombine.low %v405_v54, %v406_v19 }
 0x1a0   :  { %v416_v56 = vrot.slane %v409_v55, %v415_v53 }
 0x1a2   :  { %v423_v57 = vrot.slane %v416_v56, %v415_v53 }
 0x1a4   :  { %429 = vst.msk [vmem:[#allocation4] sm:$0x3] %vm427_vm3, %v423_v57 }
 0x1a5   :  { %511 = shalt.err (!%p508_p9)
}
 0x1a6   :  { %439 = dma.vmem_to_hbm [thread:$0]  %s437_s9, 32, %s714_s7, [#allocation5]  }
 0x1a7   :  { %522 = dma.done.wait [#allocation5], 32  }
 0x1a8   :  { %523 = vsyncadd [#allocation5], 4294967264 }
 0x1a9   :  { %443 = vsyncpa [#allocation5], 1 }

</bundles_post_ra>
